<compile_context>
chip_gen: v6e
topology: v6e:2x2x1
jax: 0.10.0
libtpu: 0.0.40
codegen_flags: <defaults>
</compile_context>

<pallas_src>
import functools

import jax
import jax.numpy as jnp
from jax.experimental import pallas as pl
from jax.experimental.pallas import tpu as pltpu


# VMEM planning: target the smallest generation (v7x has 64 MiB physical VMEM).
_VMEM_LIMIT_BYTES = 48 * 1024 * 1024     # scoped VMEM requested from Mosaic
_VMEM_BLOCK_BUDGET = 18 * 1024 * 1024    # target working set (blocks + temporaries)

_MXU_DTYPE = jnp.bfloat16                # matmul operand dtype (f32 accumulation)


# ----------------------------------------------------------------------------
# Pallas conv2d kernel
# ----------------------------------------------------------------------------
def _conv_kernel(*refs, n_in, split_halo, s, dil, KH, KW, act, has_res):
    """Fused multi-input conv tile.

    refs layout: [x blocks (1 or 2 per input)], [weights per input], bias,
    (residual), output.  Per grid step it produces `th` output rows for one
    batch element; taps are folded into the contraction (K = KW*Cin per dot).
    """
    per_in = 2 if split_halo else 1
    x_refs = refs[: n_in * per_in]
    w_refs = refs[n_in * per_in: n_in * (per_in + 1)]
    b_ref = refs[n_in * (per_in + 1)]
    res_ref = refs[n_in * (per_in + 1) + 1] if has_res else None
    o_ref = refs[-1]

    _, th, wo, cout = o_ref.shape
    acc = jnp.zeros((th * wo, cout), jnp.float32)

    for i in range(n_in):
        if split_halo:
            # main tile rows + halo rows fetched via a second blocked spec
            xt = jnp.concatenate([x_refs[2 * i][0], x_refs[2 * i + 1][0]], axis=0)
        else:
            xt = x_refs[i][0]
        xt = xt.astype(_MXU_DTYPE)
        cin = xt.shape[-1]
        w_i = w_refs[i]                       # (KH, KW*cin, cout) bf16, resident

        for kh in range(KH):
            r0 = kh * dil
            rows = xt[r0: r0 + s * th]        # contiguous leading-dim slice
            if s > 1:                          # H stride: slab select, no strided ops
                rows = rows.reshape(th, s, rows.shape[1], cin)[:, 0]
            # fold the KW taps into the contraction: (th, wo, KW*cin)
            cols = [rows[:, kw * dil: kw * dil + wo, :] for kw in range(KW)]
            patch = cols[0] if KW == 1 else jnp.concatenate(cols, axis=-1)
            patch = patch.reshape(th * wo, KW * cin)
            acc = acc + jnp.dot(patch, w_i[kh],
                                preferred_element_type=jnp.float32)

    acc = acc + b_ref[...]                     # (1, cout) f32 bias
    if act == "relu":
        acc = jnp.maximum(acc, 0.0)
    elif act == "tanh01":
        acc = (jnp.tanh(acc) + 1.0) * 0.5      # f32 epilogue (v5e-friendly)
    out = acc.reshape(th, wo, cout)
    if has_res:                                # fused ResnetBlock skip add
        out = out + res_ref[0].astype(jnp.float32)
    o_ref[0] = out.astype(o_ref.dtype)


# ----------------------------------------------------------------------------
# Tile-size planning
# ----------------------------------------------------------------------------
def _divisors_desc(n):
    return [d for d in range(n, 0, -1) if n % d == 0]


def _halo_block_rows(ah, halo):
    """Smallest divisor of `ah` (main block rows) that covers the halo."""
    if halo <= 0:
        return 0
    for bh in range(halo, ah + 1):
        if ah % bh == 0:
            return bh
    return None                                # halo taller than the main block


def _conv_block_bytes(th, s, halo, Wp, cins, KW, wo, cout, w_bytes):
    ah = th * s
    bh = _halo_block_rows(ah, halo) or 0
    cin_tot = sum(cins)
    in_b = (ah + bh) * Wp * cin_tot * 4        # f32 input blocks (main + halo)
    out_b = th * wo * cout * 4                 # f32 output block
    tmp = (ah + bh) * Wp * cin_tot * 2         # bf16 tile copy
    tmp += th * wo * KW * max(cins) * 2        # bf16 folded-tap patch
    tmp += 2 * th * wo * cout * 4              # f32 accumulator (+ slack)
    return 2 * (in_b + out_b) + tmp + 2 * w_bytes   # x2: double-buffered pipeline


def _pick_tile_rows(Ho, s, halo, Wp, cins, KW, wo, cout, w_bytes):
    fallback = Ho
    for th in _divisors_desc(Ho):
        if th != Ho and _halo_block_rows(th * s, halo) is None:
            continue
        fallback = th
        if _conv_block_bytes(th, s, halo, Wp, cins, KW, wo, cout,
                             w_bytes) <= _VMEM_BLOCK_BUDGET:
            return th
    return fallback


# ----------------------------------------------------------------------------
# conv2d wrapper
# ----------------------------------------------------------------------------
def conv2d(xs, w, b, *, stride=1, dil=1, pad=0, pad_mode="constant",
           act="none", residual=None, tile_rows=None):
    """Fused NHWC conv matching torch.nn.Conv2d(stride, dilation, padding).

    `xs` may be a list of tensors that are implicitly concatenated along C
    (fused concat); `residual` is added after the activation (fused skip)."""
    if not isinstance(xs, (list, tuple)):
        xs = [xs]
    xs = list(xs)
    N, H, W, _ = xs[0].shape
    KH, KW, cin_tot, cout = w.shape
    cins = [int(x.shape[-1]) for x in xs]
    assert sum(cins) == cin_tot
    s = int(stride)

    # spatial padding (glue).  TODO(synk): fold into the kernel's index_map.
    if pad > 0:
        xs = [jnp.pad(x, ((0, 0), (pad, pad), (pad, pad), (0, 0)), mode=pad_mode)
              for x in xs]
    if s > 1:   # the in-kernel row-stride trick over-reads (s-1) rows at the bottom
        xs = [jnp.pad(x, ((0, 0), (0, s - 1), (0, 0), (0, 0))) for x in xs]
    Hp, Wp = xs[0].shape[1], xs[0].shape[2]

    Ho = (H + 2 * pad - (KH - 1) * dil - 1) // s + 1
    wo = (W + 2 * pad) - (KW - 1) * dil        # stride-1 width (subsampled below)
    halo = (KH - 1) * dil                      # rows needed past the TH*s block

    # weights: split per fused input and fold KW into K -> (KH, KW*Cin_i, Cout)
    w_parts, off = [], 0
    for ci in cins:
        w_i = w[:, :, off:off + ci, :]
        w_parts.append(w_i.reshape(KH, KW * ci, cout).astype(_MXU_DTYPE))
        off += ci
    w_bytes = sum(int(p.size) for p in w_parts) * 2

    th = tile_rows if tile_rows is not None else _pick_tile_rows(
        Ho, s, halo, Wp, cins, KW, wo, cout, w_bytes)
    assert Ho % th == 0, (Ho, th)
    n_h = Ho // th
    split_halo = n_h > 1
    ah = th * s

    in_specs, inputs = [], []
    if split_halo:
        bh = _halo_block_rows(ah, halo)
        assert bh is not None
        rep = ah // bh
        for x, ci in zip(xs, cins):
            in_specs.append(pl.BlockSpec((1, ah, Wp, ci),
                                         lambda n, t: (n, t, 0, 0)))
            in_specs.append(pl.BlockSpec((1, bh, Wp, ci),
                                         lambda n, t, _r=rep: (n, (t + 1) * _r, 0, 0)))
            inputs += [x, x]
    else:
        for x, ci in zip(xs, cins):
            in_specs.append(pl.BlockSpec((1, Hp, Wp, ci),
                                         lambda n, t: (n, 0, 0, 0)))
            inputs.append(x)

    for w_i in w_parts:                         # weights stay resident in VMEM
        in_specs.append(pl.BlockSpec(w_i.shape, lambda n, t: (0, 0, 0)))
        inputs.append(w_i)

    in_specs.append(pl.BlockSpec((1, cout), lambda n, t: (0, 0)))
    inputs.append(b.reshape(1, cout).astype(jnp.float32))

    has_res = residual is not None
    if has_res:
        in_specs.append(pl.BlockSpec((1, th, wo, cout), lambda n, t: (n, t, 0, 0)))
        inputs.append(residual)

    kernel = functools.partial(
        _conv_kernel, n_in=len(xs), split_halo=split_halo, s=s, dil=dil,
        KH=KH, KW=KW, act=act, has_res=has_res)

    out = pl.pallas_call(
        kernel,
        out_shape=jax.ShapeDtypeStruct((N, Ho, wo, cout), jnp.float32),
        grid=(N, n_h),
        in_specs=in_specs,
        out_specs=pl.BlockSpec((1, th, wo, cout), lambda n, t: (n, t, 0, 0)),
        compiler_params=pltpu.CompilerParams(
            dimension_semantics=("parallel", "parallel"),
            vmem_limit_bytes=_VMEM_LIMIT_BYTES),
    )(*inputs)

    if s > 1:
        # TODO(synk): fold the width stride into the kernel as well (the kernel
        # already computes only the strided rows; columns are subsampled here).
        out = out[:, :, ::s, :]
    return out


# ----------------------------------------------------------------------------
# Parameter init (matches init_weights('normal', gain=0.02): W~N(0,0.02), b=0)
# ----------------------------------------------------------------------------
def _make_conv(key, kh, kw, cin, cout, gain=0.02):
    w = gain * jax.random.normal(key, (kh, kw, cin, cout), jnp.float32)
    b = jnp.zeros((cout,), jnp.float32)
    return {"w": w, "b": b}


def init_p2p_params(key, c=8, residual_blocks=2):
    keys = iter(jax.random.split(key, 64))

    def conv(cin, cout, k=3):
        return _make_conv(next(keys), k, k, cin, cout)

    p = {}
    p["input_conv"] = [conv(3, c) for _ in range(3)]
    p["S1_en"] = [conv(c, c) for _ in range(3)]
    p["down1"] = [conv(c, 2 * c) for _ in range(3)]
    p["S2_en"] = [conv(2 * c, 2 * c) for _ in range(3)]
    p["down2"] = [conv(2 * c, 4 * c) for _ in range(3)]
    p["S3_en"] = [conv(4 * c, 4 * c) for _ in range(3)]
    p["down3"] = [conv(4 * c, 8 * c) for _ in range(3)]
    p["S4_en"] = conv(3 * 8 * c, 8 * c)
    p["mid"] = [(conv(8 * c, 8 * c), conv(8 * c, 8 * c))
                for _ in range(residual_blocks)]
    p["up3"] = conv(8 * c, 4 * c)
    p["S3_de"] = conv(4 * 4 * c, 4 * c)
    p["up2"] = conv(4 * c, 2 * c)
    p["S2_de"] = conv(4 * 2 * c, 2 * c)
    p["up1"] = conv(2 * c, c)
    p["S1_de"] = conv(4 * c, c)
    p["S1_out"] = conv(c, 3, k=7)
    return p


# ----------------------------------------------------------------------------
# p2p forward
# ----------------------------------------------------------------------------
def p2p_forward(params, x_rgb, x_hsv, x_lab):
    def stream3(plist, xs, **kw):
        return tuple(conv2d(x, q["w"], q["b"], **kw) for q, x in zip(plist, xs))

    def upsample(q, x):
        # nearest x2 (glue) + 3x3 conv halving channels (kernel)
        # TODO(synk): fuse the nearest-neighbour repeat into the conv index_map.
        x = jnp.repeat(jnp.repeat(x, 2, axis=1), 2, axis=2)
        return conv2d(x, q["w"], q["b"], pad=1, act="relu")

    def decoder(q, agg, skips):
        # fused concat: weight is split along Cin inside conv2d, no HBM concat
        return conv2d([agg, *skips], q["w"], q["b"], pad=1, act="relu")

    xs = (x_rgb, x_hsv, x_lab)
    s1 = stream3(params["input_conv"], xs, pad=1, act="relu")
    s1 = stream3(params["S1_en"], s1, pad=1, dil=1, act="relu")
    s2 = stream3(params["down1"], s1, pad=1, stride=2, act="relu")
    s2 = stream3(params["S2_en"], s2, pad=2, dil=2, act="relu")
    s3 = stream3(params["down2"], s2, pad=1, stride=2, act="relu")
    s3 = stream3(params["S3_en"], s3, pad=4, dil=4, act="relu")
    s4 = stream3(params["down3"], s3, pad=1, stride=2, act="relu")

    mid = conv2d(list(s4), params["S4_en"]["w"], params["S4_en"]["b"],
                 pad=8, dil=8, act="relu")

    # ResnetBlock(c*8, 2): dilated conv + conv with fused residual add
    for q1, q2 in params["mid"]:
        y = conv2d(mid, q1["w"], q1["b"], pad=2, dil=2, act="relu")
        mid = conv2d(y, q2["w"], q2["b"], pad=1, act="none", residual=mid)

    s3_agg = upsample(params["up3"], mid)
    s3_agg = decoder(params["S3_de"], s3_agg, s3)
    s2_agg = upsample(params["up2"], s3_agg)
    s2_agg = decoder(params["S2_de"], s2_agg, s2)
    s1_agg = upsample(params["up1"], s2_agg)
    s1_agg = decoder(params["S1_de"], s1_agg, s1)

    # S1_out: ReflectionPad2d(3) + Conv2d(c, 3, 7);  out = (tanh(.) + 1) / 2
    out = conv2d(s1_agg, params["S1_out"]["w"], params["S1_out"]["b"],
                 pad=3, pad_mode="reflect", act="tanh01")
    return out


# ----------------------------------------------------------------------------
# Self-check of the tiled (halo-split) kernel path against XLA's conv
# ----------------------------------------------------------------------------
def _conv_reference(xs, w, b, *, stride=1, dil=1, pad=0, pad_mode="constant"):
    x = xs[0] if len(xs) == 1 else jnp.concatenate(xs, axis=-1)
    if pad > 0:
        x = jnp.pad(x, ((0, 0), (pad, pad), (pad, pad), (0, 0)), mode=pad_mode)
    out = jax.lax.conv_general_dilated(
        x, w, window_strides=(stride, stride), padding="VALID",
        rhs_dilation=(dil, dil),
        dimension_numbers=("NHWC", "HWIO", "NHWC"))
    return out + b


def _self_check(key):
    N, H, W = 2, 16, 16
    cases = [
        dict(n_in=1, cin=8, cout=16, stride=1, dil=1, pad=1, k=3, th=4, res=True,
             pad_mode="constant"),
        dict(n_in=1, cin=8, cout=16, stride=2, dil=1, pad=1, k=3, th=4, res=False,
             pad_mode="constant"),
        dict(n_in=2, cin=8, cout=16, stride=1, dil=2, pad=2, k=3, th=4, res=False,
             pad_mode="constant"),
        dict(n_in=1, cin=8, cout=3, stride=1, dil=1, pad=3, k=7, th=8, res=False,
             pad_mode="reflect"),
    ]
    for i, cfg in enumerate(cases):
        keys = jax.random.split(jax.random.fold_in(key, i), cfg["n_in"] + 3)
        xs = [jax.random.uniform(keys[j], (N, H, W, cfg["cin"]), jnp.float32)
              for j in range(cfg["n_in"])]
        w = 0.05 * jax.random.normal(
            keys[-3], (cfg["k"], cfg["k"], cfg["n_in"] * cfg["cin"], cfg["cout"]),
            jnp.float32)
        b = 0.1 * jax.random.normal(keys[-2], (cfg["cout"],), jnp.float32)

        ref = _conv_reference(xs, w, b, stride=cfg["stride"], dil=cfg["dil"],
                              pad=cfg["pad"], pad_mode=cfg["pad_mode"])
        res = None
        if cfg["res"]:
            res = jax.random.uniform(keys[-1], ref.shape, jnp.float32)
            ref = ref + res

        got = conv2d(xs, w, b, stride=cfg["stride"], dil=cfg["dil"],
                     pad=cfg["pad"], pad_mode=cfg["pad_mode"], act="none",
                     residual=res, tile_rows=cfg["th"])
        assert got.shape == ref.shape, (got.shape, ref.shape)
        err = float(jnp.max(jnp.abs(got - ref)))
        assert err < 2e-2, f"self-check {i}: max abs err {err}"


# ----------------------------------------------------------------------------
if __name__ == "__main__":
    key = jax.random.PRNGKey(0)
    kchk, kp, k1, k2, k3 = jax.random.split(key, 5)

    # exercise the row-tiled / halo-split kernel path against an XLA reference
    _self_check(kchk)

    c = 8          # small stand-in for the default c=64
    N, H, W = 2, 16, 16

    params = init_p2p_params(kp, c=c, residual_blocks=2)
    x_rgb = jax.random.uniform(k1, (N, H, W, 3), jnp.float32)
    x_hsv = jax.random.uniform(k2, (N, H, W, 3), jnp.float32)
    x_lab = jax.random.uniform(k3, (N, H, W, 3), jnp.float32)

    out = p2p_forward(params, x_rgb, x_hsv, x_lab)
    jax.block_until_ready(out)

    assert out.shape == (N, H, W, 3), out.shape
    assert bool(jnp.all(jnp.isfinite(out)))
    assert bool(jnp.all((out >= 0.0) & (out <= 1.0)))   # (tanh+1)/2 range
    print("KERNEL_OK")
</pallas_src>

<mosaic_0001>
module attributes {stable_mosaic.version = 11 : i64} {
  func.func @_conv_kernel(%arg0: i32, %arg1: i32, %arg2: memref<1x4x18x8xf32, #tpu.memory_space<vmem>>, %arg3: memref<1x2x18x8xf32, #tpu.memory_space<vmem>>, %arg4: memref<3x24x16xbf16, #tpu.memory_space<vmem>>, %arg5: memref<1x16xf32, #tpu.memory_space<vmem>>, %arg6: memref<1x4x16x16xf32, #tpu.memory_space<vmem>>, %arg7: memref<1x4x16x16xf32, #tpu.memory_space<vmem>>) attributes {dimension_semantics = [#tpu.dimension_semantics<parallel>, #tpu.dimension_semantics<parallel>], iteration_bounds = array<i64: 2, 4>, scalar_prefetch = 0 : i64, scratch_operands = 0 : i64, tpu.core_type = #tpu.core_type<tc>, window_params = [{transform_indices = @transform_0, window_bounds = array<i64: 1, 4, 18, 8>}, {transform_indices = @transform_1, window_bounds = array<i64: 1, 2, 18, 8>}, {pipeline_mode = #tpu.pipeline_mode<synchronous>, transform_indices = @transform_2, window_bounds = array<i64: 3, 24, 16>}, {pipeline_mode = #tpu.pipeline_mode<synchronous>, transform_indices = @transform_3, window_bounds = array<i64: 1, 16>}, {transform_indices = @transform_4, window_bounds = array<i64: 1, 4, 16, 16>}, {transform_indices = @transform_5, window_bounds = array<i64: 1, 4, 16, 16>}]} {
    %cst = arith.constant 0.000000e+00 : f32
    %0 = vector.broadcast %cst : f32 to vector<64x16xf32>
    %c0 = arith.constant 0 : index
    %c0_0 = arith.constant 0 : index
    %c0_1 = arith.constant 0 : index
    %c0_2 = arith.constant 0 : index
    %1 = vector.load %arg2[%c0, %c0_0, %c0_1, %c0_2] : memref<1x4x18x8xf32, #tpu.memory_space<vmem>>, vector<1x4x18x8xf32>
    %2 = vector.shape_cast %1 : vector<1x4x18x8xf32> to vector<4x18x8xf32>
    %c0_3 = arith.constant 0 : index
    %c0_4 = arith.constant 0 : index
    %c0_5 = arith.constant 0 : index
    %c0_6 = arith.constant 0 : index
    %3 = vector.load %arg3[%c0_3, %c0_4, %c0_5, %c0_6] : memref<1x2x18x8xf32, #tpu.memory_space<vmem>>, vector<1x2x18x8xf32>
    %4 = vector.shape_cast %3 : vector<1x2x18x8xf32> to vector<2x18x8xf32>
    %5 = tpu.concatenate %2, %4 in 0 : vector<4x18x8xf32>, vector<2x18x8xf32> -> vector<6x18x8xf32>
    %6 = arith.truncf %5 : vector<6x18x8xf32> to vector<6x18x8xbf16>
    %7 = vector.extract_strided_slice %6 {offsets = [0, 0, 0], sizes = [4, 18, 8], strides = [1, 1, 1]} : vector<6x18x8xbf16> to vector<4x18x8xbf16>
    %8 = vector.extract_strided_slice %7 {offsets = [0, 0, 0], sizes = [4, 16, 8], strides = [1, 1, 1]} : vector<4x18x8xbf16> to vector<4x16x8xbf16>
    %9 = vector.extract_strided_slice %7 {offsets = [0, 1, 0], sizes = [4, 16, 8], strides = [1, 1, 1]} : vector<4x18x8xbf16> to vector<4x16x8xbf16>
    %10 = vector.extract_strided_slice %7 {offsets = [0, 2, 0], sizes = [4, 16, 8], strides = [1, 1, 1]} : vector<4x18x8xbf16> to vector<4x16x8xbf16>
    %11 = tpu.concatenate %8, %9, %10 in 2 : vector<4x16x8xbf16>, vector<4x16x8xbf16>, vector<4x16x8xbf16> -> vector<4x16x24xbf16>
    %12 = vector.shape_cast %11 : vector<4x16x24xbf16> to vector<64x24xbf16>
    %c0_7 = arith.constant 0 : index
    %c0_8 = arith.constant 0 : index
    %c0_9 = arith.constant 0 : index
    %13 = vector.load %arg4[%c0_7, %c0_8, %c0_9] : memref<3x24x16xbf16, #tpu.memory_space<vmem>>, vector<1x24x16xbf16>
    %14 = vector.shape_cast %13 : vector<1x24x16xbf16> to vector<24x16xbf16>
    %cst_10 = arith.constant dense<0.000000e+00> : vector<64x16xf32>
    %15 = tpu.matmul %12, %14, %cst_10 {dimension_numbers = #tpu.dot_dimension_numbers<[1], [0], [0], [1], [0, 0, 1, 1], [], []>} : vector<64x24xbf16>, vector<24x16xbf16>, vector<64x16xf32> -> vector<64x16xf32>
    %16 = arith.addf %0, %15 : vector<64x16xf32>
    %17 = vector.extract_strided_slice %6 {offsets = [1, 0, 0], sizes = [4, 18, 8], strides = [1, 1, 1]} : vector<6x18x8xbf16> to vector<4x18x8xbf16>
    %18 = vector.extract_strided_slice %17 {offsets = [0, 0, 0], sizes = [4, 16, 8], strides = [1, 1, 1]} : vector<4x18x8xbf16> to vector<4x16x8xbf16>
    %19 = vector.extract_strided_slice %17 {offsets = [0, 1, 0], sizes = [4, 16, 8], strides = [1, 1, 1]} : vector<4x18x8xbf16> to vector<4x16x8xbf16>
    %20 = vector.extract_strided_slice %17 {offsets = [0, 2, 0], sizes = [4, 16, 8], strides = [1, 1, 1]} : vector<4x18x8xbf16> to vector<4x16x8xbf16>
    %21 = tpu.concatenate %18, %19, %20 in 2 : vector<4x16x8xbf16>, vector<4x16x8xbf16>, vector<4x16x8xbf16> -> vector<4x16x24xbf16>
    %22 = vector.shape_cast %21 : vector<4x16x24xbf16> to vector<64x24xbf16>
    %c1 = arith.constant 1 : index
    %c0_11 = arith.constant 0 : index
    %c0_12 = arith.constant 0 : index
    %23 = vector.load %arg4[%c1, %c0_11, %c0_12] : memref<3x24x16xbf16, #tpu.memory_space<vmem>>, vector<1x24x16xbf16>
    %24 = vector.shape_cast %23 : vector<1x24x16xbf16> to vector<24x16xbf16>
    %cst_13 = arith.constant dense<0.000000e+00> : vector<64x16xf32>
    %25 = tpu.matmul %22, %24, %cst_13 {dimension_numbers = #tpu.dot_dimension_numbers<[1], [0], [0], [1], [0, 0, 1, 1], [], []>} : vector<64x24xbf16>, vector<24x16xbf16>, vector<64x16xf32> -> vector<64x16xf32>
    %26 = arith.addf %16, %25 : vector<64x16xf32>
    %27 = vector.extract_strided_slice %6 {offsets = [2, 0, 0], sizes = [4, 18, 8], strides = [1, 1, 1]} : vector<6x18x8xbf16> to vector<4x18x8xbf16>
    %28 = vector.extract_strided_slice %27 {offsets = [0, 0, 0], sizes = [4, 16, 8], strides = [1, 1, 1]} : vector<4x18x8xbf16> to vector<4x16x8xbf16>
    %29 = vector.extract_strided_slice %27 {offsets = [0, 1, 0], sizes = [4, 16, 8], strides = [1, 1, 1]} : vector<4x18x8xbf16> to vector<4x16x8xbf16>
    %30 = vector.extract_strided_slice %27 {offsets = [0, 2, 0], sizes = [4, 16, 8], strides = [1, 1, 1]} : vector<4x18x8xbf16> to vector<4x16x8xbf16>
    %31 = tpu.concatenate %28, %29, %30 in 2 : vector<4x16x8xbf16>, vector<4x16x8xbf16>, vector<4x16x8xbf16> -> vector<4x16x24xbf16>
    %32 = vector.shape_cast %31 : vector<4x16x24xbf16> to vector<64x24xbf16>
    %c2 = arith.constant 2 : index
    %c0_14 = arith.constant 0 : index
    %c0_15 = arith.constant 0 : index
    %33 = vector.load %arg4[%c2, %c0_14, %c0_15] : memref<3x24x16xbf16, #tpu.memory_space<vmem>>, vector<1x24x16xbf16>
    %34 = vector.shape_cast %33 : vector<1x24x16xbf16> to vector<24x16xbf16>
    %cst_16 = arith.constant dense<0.000000e+00> : vector<64x16xf32>
    %35 = tpu.matmul %32, %34, %cst_16 {dimension_numbers = #tpu.dot_dimension_numbers<[1], [0], [0], [1], [0, 0, 1, 1], [], []>} : vector<64x24xbf16>, vector<24x16xbf16>, vector<64x16xf32> -> vector<64x16xf32>
    %36 = arith.addf %26, %35 : vector<64x16xf32>
    %c0_17 = arith.constant 0 : index
    %c0_18 = arith.constant 0 : index
    %37 = vector.load %arg5[%c0_17, %c0_18] : memref<1x16xf32, #tpu.memory_space<vmem>>, vector<1x16xf32>
    %38 = vector.broadcast %37 : vector<1x16xf32> to vector<64x16xf32>
    %39 = arith.addf %36, %38 : vector<64x16xf32>
    %40 = vector.shape_cast %39 : vector<64x16xf32> to vector<4x16x16xf32>
    %c0_19 = arith.constant 0 : index
    %c0_20 = arith.constant 0 : index
    %c0_21 = arith.constant 0 : index
    %c0_22 = arith.constant 0 : index
    %41 = vector.load %arg6[%c0_19, %c0_20, %c0_21, %c0_22] : memref<1x4x16x16xf32, #tpu.memory_space<vmem>>, vector<1x4x16x16xf32>
    %42 = vector.shape_cast %41 : vector<1x4x16x16xf32> to vector<4x16x16xf32>
    %43 = arith.addf %40, %42 : vector<4x16x16xf32>
    %c0_23 = arith.constant 0 : index
    %c0_24 = arith.constant 0 : index
    %c0_25 = arith.constant 0 : index
    %c0_26 = arith.constant 0 : index
    %44 = vector.load %arg7[%c0_23, %c0_24, %c0_25, %c0_26] : memref<1x4x16x16xf32, #tpu.memory_space<vmem>>, vector<1x4x16x16xf32>
    %45 = vector.shape_cast %44 : vector<1x4x16x16xf32> to vector<4x16x16xf32>
    %46 = vector.shape_cast %43 : vector<4x16x16xf32> to vector<1x4x16x16xf32>
    tpu.vector_store %arg7[%c0_23, %c0_24, %c0_25, %c0_26], %46 {strides = array<i32>} : memref<1x4x16x16xf32, #tpu.memory_space<vmem>>, vector<1x4x16x16xf32>,
    return
  }
  func.func @transform_0(%arg0: i32, %arg1: i32) -> (i32, i32, i32, i32) {
    %c0_i32 = arith.constant 0 : i32
    %c0_i32_0 = arith.constant 0 : i32
    %c0_i32_1 = arith.constant 0 : i32
    return %arg0, %arg1, %c0_i32, %c0_i32_0 : i32, i32, i32, i32
  }
  func.func @transform_1(%arg0: i32, %arg1: i32) -> (i32, i32, i32, i32) {
    %c1_i32 = arith.constant 1 : i32
    %0 = arith.addi %arg1, %c1_i32 : i32
    %c2_i32 = arith.constant 2 : i32
    %1 = arith.muli %0, %c2_i32 : i32
    %c0_i32 = arith.constant 0 : i32
    %c0_i32_0 = arith.constant 0 : i32
    %c0_i32_1 = arith.constant 0 : i32
    return %arg0, %1, %c0_i32, %c0_i32_0 : i32, i32, i32, i32
  }
  func.func @transform_2(%arg0: i32, %arg1: i32) -> (i32, i32, i32) {
    %c0_i32 = arith.constant 0 : i32
    %c0_i32_0 = arith.constant 0 : i32
    %c0_i32_1 = arith.constant 0 : i32
    %c0_i32_2 = arith.constant 0 : i32
    return %c0_i32, %c0_i32_0, %c0_i32_1 : i32, i32, i32
  }
  func.func @transform_3(%arg0: i32, %arg1: i32) -> (i32, i32) {
    %c0_i32 = arith.constant 0 : i32
    %c0_i32_0 = arith.constant 0 : i32
    %c0_i32_1 = arith.constant 0 : i32
    return %c0_i32, %c0_i32_0 : i32, i32
  }
  func.func @transform_4(%arg0: i32, %arg1: i32) -> (i32, i32, i32, i32) {
    %c0_i32 = arith.constant 0 : i32
    %c0_i32_0 = arith.constant 0 : i32
    %c0_i32_1 = arith.constant 0 : i32
    return %arg0, %arg1, %c0_i32, %c0_i32_0 : i32, i32, i32, i32
  }
  func.func @transform_5(%arg0: i32, %arg1: i32) -> (i32, i32, i32, i32) {
    %c0_i32 = arith.constant 0 : i32
    %c0_i32_0 = arith.constant 0 : i32
    %c0_i32_1 = arith.constant 0 : i32
    return %arg0, %arg1, %c0_i32, %c0_i32_0 : i32, i32, i32, i32
  }
}

</mosaic_0001>

<bundles_post_ra>
// kernel: tpu_custom_call.1
= control target key start
LH: loop header
LB: loop body
LE: loop exit
PB: predicated region body
PF: predicated region fallthrough
CT: control target
= control target key end

     0   :  { %10 = vsyncpa [#allocation3], 0  ;;  %s1683_s0 = inlined_call_operand.vmem [shape: f32[2,18,18,8], index: 0, kind: input, shape index: {}]   ;;  %s1684_s1 = inlined_call_operand.vmem [shape: f32[2,18,18,8], index: 1, kind: input, shape index: {}]   ;;  %s1685_s2 = inlined_call_operand.vmem [shape: bf16[3,24,16], index: 2, kind: input, shape index: {}]   ;;  %s1686_s3 = inlined_call_operand.vmem [shape: f32[1,16], index: 3, kind: input, shape index: {}]   ;;  %s1687_s4 = inlined_call_operand.vmem [shape: f32[2,16,16,16], index: 4, kind: input, shape index: {}]   ;;  %s1688_s5 = inlined_call_operand.hbm [shape: f32[2,16,16,16], index: 5, kind: output, shape index: {}]  }
   0x1   :  { %12 = vsyncpa [#allocation3 + $0x1], 0  ;;  %s1338_s18 = smov 0   ;;  %s1340_s19 = smov 0  }
   0x2   :  { %s1342_s20 = smov 0   ;;  %s1344_s21 = smov 0  }
   0x3   :  { %s1346_s22 = smov 0   ;;  %s1348_s23 = smov 0  }
   0x4   :  { %s1350_s24 = smov 0   ;;  %s1352_s25 = smov 0  }
   0x5 LB: > { %s1006_s26 = sadd.s32 4294967295, %s1302_s25   ;;  %s1007_s27 = sadd.s32 4294967294, %s1302_s25   ;;  %s1302_s25 = sphi %s1352_s25, %s18_s25   ;;  %s1298_s24 = sphi %s1350_s24, %s1700_s24   ;;  %s1294_s23 = sphi %s1348_s23, %s1699_s23   ;;  %s1290_s22 = sphi %s1346_s22, %s1698_s22   ;;  %s1286_s21 = sphi %s1344_s21, %s1697_s21   ;;  %s1282_s20 = sphi %s1342_s20, %s1696_s20   ;;  %s1278_s19 = sphi %s1340_s19, %s1695_s19   ;;  %s1274_s18 = sphi %s1338_s18, %s1694_s18  }
   0x6   : > { %s27_s28 = sadd.s32 1, %s1294_s23  ;;  %s30_s29 = sadd.s32 1, %s1298_s24 }
   0x7   : > { %p28_p0 = scmp.ge.s32.totalorder %s27_s28, 4  ;;  %p179_p1 = scmp.ne.s32.totalorder %s1282_s20, %s1278_s19 }
   0x8   : > { %p180_p2 = scmp.eq.s32.totalorder %s1006_s26, 7  ;;  %p185_p5 = scmp.ne.s32.totalorder %s1278_s19, %s1274_s18 }
   0x9   : > { %s1702_s28 = smov (%p28_p0, %s27_s28), 0  ;;  %s1704_s29 = smov (!%p28_p0, %s30_s29), %s1298_s24 }
   0xa   : > { %s165_s30 = ssub.s32 %s1294_s23, %s1702_s28  ;;  %p1389_p3 = por %p180_p2, %p179_p1 }
   0xb   : > { %p32_p4 = scmp.ge.s32.totalorder %s1704_s29, 2  ;;  %p186_p6 = scmp.eq.s32.totalorder %s1007_s27, 7 }
   0xc   : > { %p1012_p7 = scmp.ge.s32.totalorder %s1302_s25, 1  ;;  %p266_p9 = scmp.lt.s32.totalorder %s1302_s25, 9 }
   0xd   : > { %s1706_s29 = smov (%p32_p4, %s1704_s29), 0  ;;  %p1398_p8 = por %p186_p6, %p185_p5 }
   0xe   : > { %1691 = sst [smem:[#allocation5_spill]] %s1706_s29  ;;  %s164_s8 = ssub.s32 %s1298_s24, %s1706_s29 }
   0xf   : > { %s169_s9 = sadd.s32 1, %s1282_s20  ;;  %s166_s10 = sor.u32 %s165_s30, %s164_s8 }
  0x10   : > { %p267_p10 = pnand %p1012_p7, %p266_p9  ;;  %p167_p11 = scmp.eq.s32.totalorder %s166_s10, 0 }
  0x11   : > { %s1410_s12 = sshll.u32 (!%p267_p10), %s1286_s21, 2  ;;  %p332_p12 = scmp.lt.s32.totalorder (!%p267_p10), %s1290_s22, 1 }
  0x12   : > { %s1407_s11 = scalar_select %p167_p11, %s1282_s20, %s169_s9  }
  0x13   : > { %270 = sbr.rel (%p267_p10) target bundleno = 406 (0x196), region = 40  ;;  %p334_p13 = scmp.lt.s32.totalorder (!%p267_p10), %s1410_s12, 17 }
  0x14   : > { %s1064_s16 = sadd.s32 (!%p267_p10), 4, %s1410_s12  ;;  %p365_p1 = scmp.lt.s32.totalorder (!%p267_p10), %s1410_s12, 15 }
  0x15   : > { %p352_p0 = scmp.lt.s32.totalorder (!%p267_p10), %s1064_s16, 17 }
  0x18   : > { %s1415_s13 = scalar_select %p332_p12, %s1290_s22, 1  ;;  %v1204_v0 = vld [vmem:[%s1685_s2 + $0x14] ss:$0 sps:$4 sm:$0xff]   ;;  %vm559_vm0 = vcmask 1043456   ;;  %vm470_vm1 = vcmask 1046528   ;;  %v1205_v27 = vld [vmem:[%s1685_s2 + $0xc] sm:$0xff]  }
  0x19   : > { %s335_s14 = scalar_select %p334_p13, %s1410_s12, 17  ;;  %1124 = vmatprep.subr.msk.bf16.mxu1 %vm559_vm0, %v1204_v0  ;;  %v561_v9 = vsel %vm559_vm0, %v1204_v0, 0  ;;  %1123 = vmatprep.subr.msk.bf16.mxu0 %vm559_vm0, %v1204_v0  ;;  %vm405_vm2 = vsmask.f32 7424  ;;  %v1206_v46 = vld [vmem:[%s1685_s2 + $0x8] ss:$0 sps:$4 sm:$0xff]  }
  0x1a   : > { %s1128_s15 = smul.u32 54, %s1415_s13  ;;  %s1708_s16 = smov (!%p352_p0, %s1064_s16), 17  ;;  %1121 = vmatpush3.bf16.msra.mxu1 %v561_v9  ;;  %1084 = vmatpush3.bf16.msra.mxu0 %v561_v9  ;;  %v1207_v51 = vld [vmem:[%s1685_s2 + $0x20] ss:$0 sps:$4 sm:$0xff]   ;;  %vm500_vm3 = vcmask 130048   ;;  %vm491_vm4 = vcmask 64512  }
  0x1b   : > { %s1127_s17 = smul.u32 3, %s335_s14  ;;  %1120 = vmatprep.subr.bf16.mxu1 %v1205_v27  ;;  %1085 = vmatprep.subr.bf16.mxu0 %v1205_v27  ;;  %vm550_vm5 = vcmask 195584   ;;  %s1710_s12 = smov (!%p365_p1, %s1410_s12), 15 }
  0x1c   : > { %s1129_s29 = smul.u32 3, %s1708_s16  ;;  %s1020_s30 = sshll.u32 %s1710_s12, 1 }
  0x1d   : > { %s338_s26 = sadd.s32 %s1128_s15, %s1127_s17  ;;  %s1305_s17 = smov 8  }
  0x1e   : > { %s1015_s27 = sshll.u32 %s338_s26, 3  ;;  %s356_s14 = sadd.s32 %s1129_s29, %s1128_s15  ;;  %1122 = vmatpush3.bf16.msra.mxu1 %v1205_v27  ;;  %1086 = vmatpush3.bf16.msra.mxu0 %v1205_v27 }
  0x1f   : > { %s1425_s9 = scalar_lea.vmem %s1683_s0, %s1015_s27  ;;  %s1018_s16 = sshll.u32 %s356_s14, 3  ;;  %1125 = vmatprep.subr.msk.bf16.mxu1 %vm559_vm0, %v1206_v46  ;;  %1126 = vmatprep.subr.msk.bf16.mxu0 %vm559_vm0, %v1207_v51 }
  0x20   : > { %v384_v1 = vld [vmem:[%s1425_s9 + $0x48] sm:$0xff]  ;;  %v385_v2 = vld [vmem:[%s1425_s9 + $0x50] sm:$0xff]  ;;  %v386_v3 = vld [vmem:[%s1425_s9 + $0x58] sm:$0x3]  ;;  %s1304_s15 = smov 16   ;;  %s1468_s8 = scalar_lea.vmem %s1684_s1, %s1018_s16 }
  0x21   : > { %v1433_v4 = vpack.c.bf16 %v385_v2, %v384_v1  ;;  %v400_v5 = vpack.c.bf16 %v386_v3, %v386_v3  ;;  %v378_v6 = vld [vmem:[%s1425_s9 + $0x18] sm:$0xff]  ;;  %v379_v7 = vld [vmem:[%s1425_s9 + $0x20] sm:$0xff]  ;;  %v380_v8 = vld [vmem:[%s1425_s9 + $0x28] sm:$0x3]  ;;  %s323_s14 = sand.u32 1, %s1278_s19  }
  0x22   : > { %v1441_v10 = vpack.c.bf16 %v379_v7, %v378_v6  ;;  %v1443_v11 = vpack.c.bf16 %v380_v8, %v380_v8  ;;  %v381_v12 = vld [vmem:[%s1425_s9 + $0x30] sm:$0xff]  ;;  %v382_v13 = vld [vmem:[%s1425_s9 + $0x38] sm:$0xff]  ;;  %v383_v14 = vld [vmem:[%s1425_s9 + $0x40] sm:$0x3] }
  0x23   : > { %v480_v15 = vrot.slane %v1433_v4, 1  ;;  %v481_v16 = vrot.slane %v400_v5, 1  ;;  %v443_v17 = vshrl.u32 %v1433_v4, 16  ;;  %v445_v18 = vshll.u32 %v1433_v4, 16  ;;  %v375_v30 = vld [vmem:[%s1425_s9] sm:$0xff]  ;;  %v376_v31 = vld [vmem:[%s1425_s9 + $0x8] sm:$0xff] }
  0x24   : > { %v419_v19 = vshrl.u32 %v1441_v10, 16  ;;  %v421_v20 = vshll.u32 %v1441_v10, 16  ;;  %v426_v21 = vshll.u32 %v1443_v11, 16  ;;  %v450_v22 = vshll.u32 %v400_v5, 16  ;;  %v387_v32 = vld [vmem:[%s1468_s8] sm:$0xff]  ;;  %v388_v33 = vld [vmem:[%s1468_s8 + $0x8] sm:$0xff] }
  0x25   : > { %v482_v23 = vsel %vm470_vm1, %v480_v15, %v481_v16  ;;  %v447_v24 = vrot.slane %v445_v18, 1  ;;  %v1457_v25 = vpack.c.bf16 %v382_v13, %v381_v12  ;;  %v1459_v26 = vpack.c.bf16 %v383_v14, %v383_v14  ;;  %v389_v34 = vld [vmem:[%s1468_s8 + $0x10] sm:$0x3]  ;;  %v390_v59 = vld [vmem:[%s1468_s8 + $0x18] sm:$0xff]  ;;  %v391_v60 = vld [vmem:[%s1468_s8 + $0x20] sm:$0xff] }
  0x26   : > { %489 = vrot.lane.b32.xlu0 %v482_v23, %s1304_s15  ;;  %v423_v28 = vrot.slane %v421_v20, 1  ;;  %v428_v29 = vrot.slane %v426_v21, 1  ;;  %v1477_v37 = vpack.c.bf16 %v388_v33, %v387_v32  ;;  %v402_v38 = vpack.c.bf16 %v389_v34, %v389_v34  ;;  %v377_v44 = vld [vmem:[%s1425_s9 + $0x10] sm:$0x3]  ;;  %v392_v1 = vld [vmem:[%s1468_s8 + $0x28] sm:$0x3] }
  0x27   : > { %v431_v35 = vshrl.u32 %v1457_v25, 16  ;;  %v433_v36 = vshll.u32 %v1457_v25, 16  ;;  %v438_v40 = vshll.u32 %v1459_v26, 16  ;;  %v448_v41 = vor.u32 %v447_v24, %v443_v17  ;;  %s1021_s8 = sshll.u32 %s1415_s13, 5  ;;  %s1306_s13 = smov [#allocation2]  }
  0x28   : > { %v424_v39 = vor.u32 %v423_v28, %v419_v19  ;;  %v452_v42 = vrot.slane %v450_v22, 1  ;;  %v1481_v45 = vpack.c.bf16 %v376_v31, %v375_v30  ;;  %v528_v47 = vrot.slane %v1477_v37, 1  ;;  %s369_s10 = sadd.s32 %s1021_s8, %s1020_s30  ;;  %s1062_s30 = sshll.u32 %s1286_s21, 3 }
  0x29   : > { %v435_v43 = vrot.slane %v433_v36, 1  ;;  %v529_v48 = vrot.slane %v402_v38, 1  ;;  %v440_v50 = vrot.slane %v438_v40, 1  ;;  %v513_v53 = vshrl.u32 %v1477_v37, 16  ;;  %s1022_s29 = sshll.u32 %s369_s10, 3  ;;  %s1051_s8 = sshll.u32 %s1290_s22, 5 }
  0x2a   : > { %v429_v49 = vsel %vm405_vm2, %v424_v39, %v428_v29  ;;  %v515_v54 = vshll.u32 %v1477_v37, 16  ;;  %v474_v56 = vrot.slane %v1441_v10, 1  ;;  %v520_v57 = vshll.u32 %v402_v38, 16  ;;  %s1576_s26 = scalar_lea.vmem %s1687_s4, %s1022_s29  ;;  %s876_s21 = sadd.s32 %s1062_s30, %s1051_s8 }
  0x2b   : > { %456 = vrot.lane.b32.xlu1 %v429_v49, %s1305_s17  ;;  %v436_v52 = vor.u32 %v435_v43, %v431_v35  ;;  %v530_v55 = vsel %vm470_vm1, %v528_v47, %v529_v48  ;;  %v394_v58 = vpack.c.bf16 %v377_v44, %v377_v44  ;;  %v475_v62 = vrot.slane %v1443_v11, 1  ;;  %v1208_v47 = vld [vmem:[%s1685_s2] sm:$0xff]   ;;  %s1052_s10 = sshll.u32 %s876_s21, 7 }
  0x2c   : > { %531 = vrot.lane.b32.xlu0 %v530_v55, %s1304_s15  ;;  %v517_v63 = vrot.slane %v515_v54, 1  ;;  %v409_v0 = vshll.u32 %v1481_v45, 16  ;;  %v453_v2 = vsel %vm405_vm2, %v448_v41, %v452_v42  ;;  %v522_v3 = vrot.slane %v520_v57, 1  ;;  %s1625_s9 = scalar_lea.hbm %s1688_s5, %s1052_s10 }
  0x2d   : > { %v441_v61 = vsel %vm405_vm2, %v436_v52, %v440_v50  ;;  %v407_v5 = vshrl.u32 %v1481_v45, 16  ;;  %v414_v6 = vshll.u32 %v394_v58, 16  ;;  %v1508_v9 = vpack.c.bf16 %v391_v60, %v390_v59  ;;  %v1209_v52 = vld [vmem:[%s1685_s2 + $0x18] sm:$0xff]  }
  0x2e   : > { %v518_v7 = vor.u32 %v517_v63, %v513_v53  ;;  %v411_v8 = vrot.slane %v409_v0, 1  ;;  %v477_v12 = vrot.slane %v1457_v25, 1  ;;  %v478_v11 = vrot.slane %v1459_v26, 1 }
  0x2f   : > { %458 = vrot.lane.b32.xlu1 %v441_v61, %s1305_s17  ;;  %v404_v13 = vpack.c.bf16 %v392_v1, %v392_v1  ;;  %v476_v14 = vsel %vm470_vm1, %v474_v56, %v475_v62  ;;  %v416_v16 = vrot.slane %v414_v6, 1  ;;  %v708_v18 = vshrl.u32 %v1508_v9, 16 }
  0x30   : > { %460 = vrot.lane.b32.xlu0 %v453_v2, %s1305_s17  ;;  %v523_v15 = vsel %vm405_vm2, %v518_v7, %v522_v3  ;;  %v412_v17 = vor.u32 %v411_v8, %v407_v5  ;;  %v710_v19 = vshll.u32 %v1508_v9, 16  ;;  %v640_v21 = vsel %vm559_vm0, %v1206_v46, 0 }
  0x31   : > { %v715_v20 = vshll.u32 %v404_v13, 16  ;;  %v748_v22 = vsel %vm559_vm0, %v1207_v51, 0  ;;  %v479_v23 = vsel %vm470_vm1, %v477_v12, %v478_v11  ;;  %v471_v24 = vrot.slane %v1481_v45, 1 }
  0x32   : > { %v472_v26 = vrot.slane %v394_v58, 1  ;;  %v712_v27 = vrot.slane %v710_v19, 1  ;;  %v417_v28 = vsel %vm405_vm2, %v412_v17, %v416_v16  ;;  %v723_v32 = vrot.slane %v1508_v9, 1  ;;  %v838_v19 = vld [vmem:[%s1576_s26] sm:$0xff] }
  0x33   : > { %524 = vrot.lane.b32.xlu1 %v523_v15, %s1305_s17  ;;  %v717_v30 = vrot.slane %v715_v20, 1  ;;  %v724_v33 = vrot.slane %v404_v13, 1  ;;  %v840_v13 = vld [vmem:[%s1576_s26 + $0x10] sm:$0xff] }
  0x34   : > { %485 = vrot.lane.b32.xlu0 %v476_v14, %s1304_s15  ;;  %v713_v29 = vor.u32 %v712_v27, %v708_v18  ;;  %v473_v31 = vsel %vm470_vm1, %v471_v24, %v472_v26  ;;  %v841_v27 = vld [vmem:[%s1576_s26 + $0x18] sm:$0xff] }
  0x35   : > { %v725_v35 = vsel %vm470_vm1, %v723_v32, %v724_v33 }
  0x36   : > { %v718_v34 = vsel %vm405_vm2, %v713_v29, %v717_v30 }
  0x37   : > { %487 = vrot.lane.b32.xlu1 %v479_v23, %s1304_s15 }
  0x38   : > { %454 = vrot.lane.b32.xlu0 %v417_v28, %s1305_s17 }
  0x3b   : > { %483 = vrot.lane.b32.xlu1 %v473_v31, %s1304_s15 }
  0x3c   : > { %719 = vrot.lane.b32.xlu0 %v718_v34, %s1305_s17  ;;  %v839_v34 = vld [vmem:[%s1576_s26 + $0x8] sm:$0xff] }
  0x3f   : > { %726 = vrot.lane.b32.xlu1 %v725_v35, %s1304_s15  ;;  %s1013_s15 = sshll.u32 %s323_s14, 6 }
  0x40   : > { %s1590_s27 = scalar_lea.vmem [#allocation2], %s1013_s15  ;;  %s1214_s15 = sshll.u32 %s1306_s13, 4  ;;  %s1215_s15 = int_to_ptr.vmem [resolvable:$false] %s1214_s15 }
  0x41   : > { %s879_s22 = sshll.u32 %s1590_s27, 4  ;;  %s1216_s30 = scalar_lea.vmem %s1215_s15, 2048  ;;  %s1618_s22 = int_to_ptr.vmem [resolvable:$true] %s879_s22 }
  0x42   : > { %s1210_s12 = scalar_lea.vmem %s1618_s22, 1024  ;;  %p1217_p6 = scmp.lt.s32.totalorder %s1618_s22, %s1215_s15 }
  0x43   : > { %p1211_p2 = scmp.ne.s32.totalorder %s1618_s22, %s1210_s12  ;;  %p1218_p7 = scmp.lt.s32.totalorder %s1216_s30, %s1210_s12 }
  0x45   : > { %p1212_p4 = pnand %p1211_p2, %p1389_p3  ;;  %p1219_p9 = por %p1218_p7, %p1217_p6 }
  0x47   : > { %p1213_p5 = pneg %p1212_p4 }
  0x49   : > { %p1220_p10 = pnand %p1219_p9, %p1213_p5 }
  0x98   : > { %v490_v36 = vpop.permute.xlu0 %489 }
  0x9d   : > { %v457_v38 = vpop.permute.xlu1 %456 }
  0x9e   : > { %v532_v39 = vpop.permute.xlu0 %531  ;;  %v495_v48 = vsel %vm491_vm4, %v1441_v10, %v457_v38 }
  0xa1   : > { %v459_v40 = vpop.permute.xlu1 %458 }
  0xa2   : > { %v461_v41 = vpop.permute.xlu0 %460  ;;  %v497_v51 = vsel %vm491_vm4, %v1457_v25, %v459_v40 }
  0xa3   : > { %v499_v42 = vsel %vm491_vm4, %v1433_v4, %v461_v41 }
  0xa4   : > { %v508_v43 = vsel %vm500_vm3, %v499_v42, %v490_v36  ;;  %v844_v42 = vld [vmem:[%s1576_s26 + $0x30] sm:$0xff] }
  0xa5   : > { %v525_v44 = vpop.permute.xlu1 %524  ;;  %1091 = vmatprep.mubr.msk.bf16.mxu1 %vm550_vm5, %v508_v43 }
  0xa6   : > { %v534_v46 = vsel %vm491_vm4, %v1477_v37, %v525_v44  ;;  %v486_v49 = vpop.permute.xlu0 %485 }
  0xa7   : > { %v536_v50 = vsel %vm500_vm3, %v534_v46, %v532_v39  ;;  %v504_v4 = vsel %vm500_vm3, %v495_v48, %v486_v49 }
  0xa8   : > { %1092 = vmatmul.mubr.msk.bf16.vlgmr.msra.gmra.mxu1 %vm550_vm5, %v536_v50  ;;  %1087 = vmatprep.mubr.msk.bf16.mxu0 %vm550_vm5, %v504_v4 }
  0xa9   : > { %1096 = vmatpush3.bf16.msra.mxu1 %v640_v21  ;;  %v488_v37 = vpop.permute.xlu1 %487 }
  0xaa   : > { %v506_v10 = vsel %vm500_vm3, %v497_v51, %v488_v37  ;;  %1097 = vmatprep.subr.bf16.mxu1 %v1208_v47  ;;  %v455_v53 = vpop.permute.xlu0 %454 }
  0xab   : > { %1088 = vmatmul.mubr.msk.bf16.vlgmr.msra.gmra.mxu0 %vm550_vm5, %v506_v10  ;;  %v493_v25 = vsel %vm491_vm4, %v1481_v45, %v455_v53  ;;  %v845_v53 = vld [vmem:[%s1576_s26 + $0x38] sm:$0xff] }
  0xac   : > { %1108 = vmatpush3.bf16.msra.mxu0 %v748_v22  ;;  %1111 = vmatprep.mubr.msk.bf16.mxu0 %vm550_vm5, %v506_v10 }
  0xad   : > { %1098 = vmatpush3.bf16.msra.mxu1 %v1208_v47  ;;  %v484_v54 = vpop.permute.xlu1 %483  ;;  %1109 = vmatprep.subr.bf16.mxu0 %v1209_v52 }
  0xae   : > { %v502_v55 = vsel %vm500_vm3, %v493_v25, %v484_v54  ;;  %v720_v56 = vpop.permute.xlu0 %719 }
  0xaf   : > { %1099 = vmatprep.mubr.msk.bf16.mxu1 %vm550_vm5, %v502_v55  ;;  %v729_v45 = vsel %vm491_vm4, %v1508_v9, %v720_v56  ;;  %v1581_v9 = vld [vmem:[%s1686_s3] ss:$0 sm:$0xff] }
  0xb0   : > { %1110 = vmatpush3.bf16.msra.mxu0 %v1209_v52  ;;  %1100 = vmatmul.mubr.msk.bf16.vlgmr.msra.gmra.mxu1 %vm550_vm5, %v504_v4 }
  0xb1   : > { %1103 = vmatprep.mubr.msk.bf16.mxu1 %vm550_vm5, %v506_v10  ;;  %v727_v57 = vpop.permute.xlu1 %726 }
  0xb2   : > { %v731_v58 = vsel %vm500_vm3, %v729_v45, %v727_v57  ;;  %v843_v45 = vld [vmem:[%s1576_s26 + $0x28] sm:$0xff] }
  0xb3   : > { %1112 = vmatmul.mubr.msk.bf16.vlgmr.msra.gmra.mxu0 %vm550_vm5, %v508_v43 }
  0xb4   : > { %1115 = vmatprep.mubr.msk.bf16.mxu0 %vm550_vm5, %v536_v50  ;;  %v842_v50 = vld [vmem:[%s1576_s26 + $0x20] sm:$0xff]  ;;  %s1631_s26 = scalar_lea.sflag [#allocation3], %s323_s14 }
  0xb8   : > { %1104 = vmatmul.mubr.msk.bf16.gmra.mxu1 %vm550_vm5, %v508_v43 }
  0xbb   : > { %1116 = vmatmul.mubr.msk.bf16.gmra.mxu0 %vm550_vm5, %v731_v58 }
 0x168   : > { %v1093_v59 = vpop.f32.mrf.mxu1 }
 0x16a   : > { %v613_v60 = vpop.f32.mrf.mxu1 }
 0x16b   : > { %v1089_v61 = vpop.f32.mrf.mxu0 }
 0x16c   : > { %v1094_v62 = vpop.f32.mrf.mxu1 }
 0x16d   : > { %v597_v63 = vpop.f32.mrf.mxu0 }
 0x16e   : > { %v616_v0 = vpop.f32.mrf.mxu1 }
 0x16f   : > { %v1090_v1 = vpop.f32.mrf.mxu0 }
 0x170   : > { %v1101_v2 = vpop.f32.mrf.mxu1 }
 0x171   : > { %v685_v3 = vadd.f32 %v1101_v2, %v1089_v61  ;;  %v600_v5 = vpop.f32.mrf.mxu0 }
 0x172   : > { %v676_v6 = vpop.f32.mrf.mxu1 }
 0x173   : > { %v677_v7 = vadd.f32 %v676_v6, %v597_v63  ;;  %v1113_v8 = vpop.f32.mrf.mxu0 }
 0x174   : > { %v817_v12 = vadd.f32 %v1113_v8, %v685_v3  ;;  %v1102_v11 = vpop.f32.mrf.mxu1 }
 0x175   : > { %v688_v14 = vadd.f32 %v1102_v11, %v1090_v1  ;;  %v784_v15 = vpop.f32.mrf.mxu0 }
 0x176   : > { %v832_v16 = vadd.f32 %v1581_v9, %v817_v12  ;;  %v815_v17 = vadd.f32 %v784_v15, %v677_v7  ;;  %v679_v18 = vpop.f32.mrf.mxu1 }
 0x177   : > { %v680_v20 = vadd.f32 %v679_v18, %v600_v5  ;;  %v1114_v21 = vpop.f32.mrf.mxu0 }
 0x178   : > { %v848_v22 = vadd.f32 %v840_v13, %v832_v16  ;;  %v830_v23 = vadd.f32 %v1581_v9, %v815_v17  ;;  %v818_v24 = vadd.f32 %v1114_v21, %v688_v14  ;;  %v1105_v26 = vpop.f32.mrf.mxu1 }
 0x179   : > { %v701_v28 = vadd.f32 %v1105_v26, %v1093_v59  ;;  %v787_v29 = vpop.f32.mrf.mxu0 }
 0x17a   : > { %856 = vst.msk [vmem:[%s1590_s27 + $0x10] sm:$0xff] %vm500_vm3, %v848_v22  ;;  %v846_v30 = vadd.f32 %v838_v19, %v830_v23  ;;  %v833_v31 = vadd.f32 %v1581_v9, %v818_v24  ;;  %v816_v32 = vadd.f32 %v787_v29, %v680_v20  ;;  %v692_v33 = vpop.f32.mrf.mxu1 }
 0x17b   : > { %v693_v35 = vadd.f32 %v692_v33, %v613_v60  ;;  %v1117_v36 = vpop.f32.mrf.mxu0 }
 0x17c   : > { %854 = vst.msk [vmem:[%s1590_s27] sm:$0xff] %vm500_vm3, %v846_v30  ;;  %v849_v38 = vadd.f32 %v841_v27, %v833_v31  ;;  %v831_v39 = vadd.f32 %v1581_v9, %v816_v32  ;;  %v821_v40 = vadd.f32 %v1117_v36, %v701_v28  ;;  %v1106_v41 = vpop.f32.mrf.mxu1 }
 0x17d   : > { %v704_v43 = vadd.f32 %v1106_v41, %v1094_v62  ;;  %v800_v44 = vpop.f32.mrf.mxu0 }
 0x17e   : > { %857 = vst.msk [vmem:[%s1590_s27 + $0x18] sm:$0xff] %vm500_vm3, %v849_v38  ;;  %v847_v46 = vadd.f32 %v839_v34, %v831_v39  ;;  %v836_v47 = vadd.f32 %v1581_v9, %v821_v40  ;;  %v819_v48 = vadd.f32 %v800_v44, %v693_v35  ;;  %v695_v49 = vpop.f32.mrf.mxu1 }
 0x17f   : > { %v696_v4 = vadd.f32 %v695_v49, %v616_v0  ;;  %v1118_v51 = vpop.f32.mrf.mxu0 }
 0x180   : > { %855 = vst.msk [vmem:[%s1590_s27 + $0x8] sm:$0xff] %vm500_vm3, %v847_v46  ;;  %v852_v37 = vadd.f32 %v844_v42, %v836_v47  ;;  %v834_v52 = vadd.f32 %v1581_v9, %v819_v48  ;;  %v822_v10 = vadd.f32 %v1118_v51, %v704_v43 }
 0x181   : > { %v803_v25 = vpop.f32.mrf.mxu0 }
 0x182   : > { %860 = vst.msk [vmem:[%s1590_s27 + $0x30] sm:$0xff] %vm500_vm3, %v852_v37  ;;  %v850_v54 = vadd.f32 %v842_v50, %v834_v52  ;;  %v837_v55 = vadd.f32 %v1581_v9, %v822_v10  ;;  %v820_v56 = vadd.f32 %v803_v25, %v696_v4 }
 0x184   : > { %858 = vst.msk [vmem:[%s1590_s27 + $0x20] sm:$0xff] %vm500_vm3, %v850_v54  ;;  %v853_v57 = vadd.f32 %v845_v53, %v837_v55  ;;  %v835_v58 = vadd.f32 %v1581_v9, %v820_v56 }
 0x186   : > { %861 = vst.msk [vmem:[%s1590_s27 + $0x38] sm:$0xff] %vm500_vm3, %v853_v57  ;;  %v851_v59 = vadd.f32 %v843_v45, %v835_v58 }
 0x188   : > { %859 = vst.msk [vmem:[%s1590_s27 + $0x28] sm:$0xff] %vm500_vm3, %v851_v59 }
 0x189   : > { %1223 = shalt.err (!%p1220_p10)
}
 0x18a   : > { %s1224_s14 = scalar_lea.hbm %s1625_s9, 1024  ;;  %s1228_s21 = scalar_lea.hbm %s1688_s5, 8192 }
 0x18b   : > { %p1225_p11 = scmp.ne.s32.totalorder %s1625_s9, %s1224_s14  ;;  %p1229_p0 = scmp.lt.s32.totalorder %s1625_s9, %s1688_s5 }
 0x18c   : > { %p1230_p1 = scmp.lt.s32.totalorder %s1228_s21, %s1224_s14 }
 0x18d   : > { %p1226_p12 = pnand %p1225_p11, %p1389_p3 }
 0x18e   : > { %p1231_p2 = por %p1230_p1, %p1229_p0 }
 0x18f   : > { %p1227_p13 = pneg %p1226_p12 }
 0x191   : > { %p1232_p4 = pnand %p1231_p2, %p1227_p13 }
 0x193   : > { %1235 = shalt.err (!%p1232_p4)
}
 0x194   : > { %s1307_s16 = smov 128  }
 0x195   : > { %1130 = dma.vmem_to_hbm [thread:$0]  (%p1389_p3), %s1618_s22, 1024, %s1625_s9, %s1631_s26, %s1307_s16, %s1307_s16, %s1305_s17  }
 0x196 PF: > { %p1136_p5 = scmp.ge.s32.totalorder %s1302_s25, 2  ;;  %s894_s12 = sand.u32 1, %s1274_s18  }
 0x197   : > { %s895_s13 = scalar_lea.sflag [#allocation3], %s894_s12 }
 0x198   : > { %p1133_p6 = pnand %p1136_p5, %p1398_p8 }
 0x19a   : > { %p1134_p7 = pneg %p1133_p6 }
 0x19c   : > { %1269 = dma.done.wait (%p1134_p7), %s895_s13, 1024  }
 0x19d   : > { %1271 = vsyncadd (%p1134_p7), %s895_s13, 4294966272  ;;  %s18_s25 = sadd.s32 1, %s1302_s25   ;;  %s1693_s6 = sld [smem:[#allocation5_spill]] }
 0x19e   : > { %p15_p9 = scmp.ge.s32.totalorder %s18_s25, 10   ;;  %s1694_s18 = smov %s1278_s19 }
 0x19f   : > { %s1695_s19 = smov %s1282_s20  ;;  %s1696_s20 = smov %s1407_s11 }
 0x1a0   : > { %s1697_s21 = smov %s1294_s23  ;;  %s1698_s22 = smov %s1298_s24 }
 0x1a1   : > { %s1699_s23 = smov %s1702_s28  ;;  %17 = sbr.rel (!%p15_p9) target bundleno = 5 (0x5), region = 83 }
 0x1a3   : > { %s1700_s24 = smov %s1693_s6 }
 0x1a6   :  { %900 = vsyncpa [#allocation3], 1 }
 0x1a7   :  { %902 = vsyncpa [#allocation3 + $0x1], 1 }

</bundles_post_ra>
